<compile_context>
chip_gen: v7x
topology: tpu7x:2x2x1
jax: 0.10.0
libtpu: 0.0.40
codegen_flags: <defaults>
</compile_context>

<pallas_src>
import jax
import jax.numpy as jnp
from jax.experimental import pallas as pl
from jax.experimental.pallas import tpu as pltpu


def _round_up(x, m):
    return (x + m - 1) // m * m


def _vmem_capacity_bytes():
    try:
        info = pltpu.get_tpu_info()
        cap = int(getattr(info, "vmem_capacity_bytes", 64 << 20))
        return cap if cap > 0 else (64 << 20)
    except Exception:
        return 64 << 20  # conservative (v7x-sized) fallback


def _pick_tiles(n, vmem_cap_bytes):
    """Return (n_pad, tm, tk) with tm | n_pad and tk | n_pad."""
    n128 = _round_up(n, 128)
    if n128 <= 1024:
        n_pad = n128
        tk = n_pad
        # >= 2 row tiles when possible so both v7x TensorCores get work.
        tm = n_pad // 2 if n_pad >= 256 else n_pad
    elif n128 <= 4096:
        n_pad = _round_up(n, 512)
        tk = n_pad
        tm = 512
    else:
        # Large graphs: big adj tiles to amortize per-step overhead, sized per
        # generation (v7x: 64 MiB VMEM -> tk=2048; v5e/v6e: 128 MiB -> tk=4096).
        tk = 4096 if vmem_cap_bytes >= (100 << 20) else 2048
        tm = 1024
        n_pad = _round_up(n, tk)
    return n_pad, tm, tk


def variational_gcn_encoder(x, edge_index, w_mu, b_mu, w_ls, b_ls):
    """Forward pass. x: [N, F_in] f32, edge_index: [2, E] int32.

    Returns (mu, log_std), each [N, F_out] f32.
    """
    n, f_in = x.shape
    f_out = w_mu.shape[1]

    # ---- fused (mu | logstd) params, lane-padded (256-aligned past 128 for
    # the 256-wide MXU on v6e/v7x) ----
    f_cat = 2 * f_out
    f_pad = 128 if f_cat <= 128 else _round_up(f_cat, 256)
    w_cat = jnp.concatenate([w_mu, w_ls], axis=1)                  # [Fin, 2Fo]
    b_cat = jnp.concatenate(
        [b_mu.reshape(1, f_out), b_ls.reshape(1, f_out)], axis=1)  # [1, 2Fo]
    w_cat = jnp.pad(w_cat, ((0, 0), (0, f_pad - f_cat)))
    b_cat = jnp.pad(b_cat, ((0, 0), (0, f_pad - f_cat)))

    # ---- per-generation tile selection ----
    vmem_cap = _vmem_capacity_bytes()
    n_pad, tm, tk = _pick_tiles(n, vmem_cap)
    k_steps = n_pad // tk
    grid = (n_pad // tm, k_steps)

    # ---- plain-JAX glue: dense symmetrically-normalized adjacency, built
    # directly at padded size, cast to bf16 once ----
    # Note: self-loops are added unconditionally (matches graphs without
    # pre-existing self-loops; PyG's add_remaining_self_loops would dedupe).
    row, col = edge_index[0], edge_index[1]
    loops = jnp.arange(n, dtype=edge_index.dtype)
    row_f = jnp.concatenate([row, loops])
    col_f = jnp.concatenate([col, loops])
    ew = jnp.ones(row_f.shape[0], jnp.float32)
    deg = jnp.zeros((n,), jnp.float32).at[col_f].add(ew)
    dis = jnp.where(deg > 0, jax.lax.rsqrt(deg), 0.0)
    norm = dis[row_f] * ew * dis[col_f]
    # out[i] = sum_{edges j->i} norm * (xW)[j]  =>  Ahat[i, j] = norm
    adj = (jnp.zeros((n_pad, n_pad), jnp.float32)
           .at[col_f, row_f].add(norm)
           .astype(jnp.bfloat16))

    # ---- hoisted X @ W: computed once in f32, padded, cast to bf16 once;
    # reshaped to (K, tk, f_pad) so the kernel indexes the K block by
    # program_id with a cheap leading-axis load (kept fully VMEM-resident) ----
    xw = x @ w_cat                                                  # [N, Fp]
    xw = jnp.pad(xw, ((0, n_pad - n), (0, 0))).astype(jnp.bfloat16)
    xw = xw.reshape(k_steps, tk, f_pad)

    def _vgcn_kernel(adj_ref, xw_ref, b_ref, out_ref):
        """One (row-tile i, reduction-tile k) step of  Ahat @ XW + b.

        adj_ref : [tm, tk]            bf16  normalized adjacency tile (streamed)
        xw_ref  : [K, tk, Fp]         bf16  precomputed X@W, VMEM-resident
        b_ref   : [1, Fp]             f32   fused bias
        out_ref : [tm, Fp]            f32   resident output block (accumulator)
        """
        k = pl.program_id(1)

        @pl.when(k == 0)
        def _init():
            out_ref[...] = jnp.broadcast_to(b_ref[...], out_ref.shape)

        out_ref[...] += jnp.dot(
            adj_ref[...], xw_ref[k], preferred_element_type=jnp.float32)

    vmem_limit = min(int(vmem_cap * 3 // 4), 112 * 1024 * 1024)

    out = pl.pallas_call(
        _vgcn_kernel,
        out_shape=jax.ShapeDtypeStruct((n_pad, f_pad), jnp.float32),
        grid_spec=pltpu.PrefetchScalarGridSpec(
            num_scalar_prefetch=0,
            grid=grid,
            in_specs=[
                pl.BlockSpec((tm, tk), lambda i, k: (i, k)),              # adj
                pl.BlockSpec((k_steps, tk, f_pad), lambda i, k: (0, 0, 0)),  # XW resident
                pl.BlockSpec((1, f_pad), lambda i, k: (0, 0)),            # bias
            ],
            out_specs=pl.BlockSpec((tm, f_pad), lambda i, k: (i, 0)),
        ),
        compiler_params=pltpu.CompilerParams(
            dimension_semantics=("parallel", "arbitrary"),
            vmem_limit_bytes=vmem_limit,
        ),
    )(adj, xw, b_cat)

    mu = out[:n, :f_out]
    log_std = out[:n, f_out:f_cat]
    return mu, log_std


if __name__ == "__main__":
    N, F_IN, F_OUT = 64, 32, 16

    key = jax.random.PRNGKey(0)
    kx, kwm, kwl = jax.random.split(key, 3)

    # deterministic inputs
    x = jax.random.normal(kx, (N, F_IN), dtype=jnp.float32)

    # deterministic graph: ring, both directions => edge_index [2, 2N]
    src = jnp.arange(N, dtype=jnp.int32)
    dst = (src + 1) % N
    edge_index = jnp.stack(
        [jnp.concatenate([src, dst]), jnp.concatenate([dst, src])], axis=0
    )

    # deterministic parameters (glorot-ish scale; biases zero like PyG GCNConv)
    scale = (2.0 / (F_IN + F_OUT)) ** 0.5
    w_mu = scale * jax.random.normal(kwm, (F_IN, F_OUT), dtype=jnp.float32)
    w_ls = scale * jax.random.normal(kwl, (F_IN, F_OUT), dtype=jnp.float32)
    b_mu = jnp.zeros((1, F_OUT), dtype=jnp.float32)
    b_ls = jnp.zeros((1, F_OUT), dtype=jnp.float32)

    mu, log_std = variational_gcn_encoder(x, edge_index, w_mu, b_mu, w_ls, b_ls)
    jax.block_until_ready((mu, log_std))

    # ---- reference check in plain JAX (f32 adjacency) ----
    row, col = edge_index[0], edge_index[1]
    loops = jnp.arange(N, dtype=jnp.int32)
    row_f = jnp.concatenate([row, loops])
    col_f = jnp.concatenate([col, loops])
    deg = jnp.zeros((N,), jnp.float32).at[col_f].add(1.0)
    dis = jnp.where(deg > 0, 1.0 / jnp.sqrt(deg), 0.0)
    norm = dis[row_f] * dis[col_f]
    adj_ref = jnp.zeros((N, N), jnp.float32).at[col_f, row_f].add(norm)
    mu_ref = adj_ref @ (x @ w_mu) + b_mu
    ls_ref = adj_ref @ (x @ w_ls) + b_ls
    # adj / XW travel as bf16 (f32 accumulation) -> loosen tolerance vs f32 ref
    assert jnp.allclose(mu, mu_ref, atol=3e-2, rtol=3e-2)
    assert jnp.allclose(log_std, ls_ref, atol=3e-2, rtol=3e-2)
    assert mu.shape == (N, F_OUT) and log_std.shape == (N, F_OUT)

    print("KERNEL_OK")
</pallas_src>

<mosaic_0001>
module attributes {stable_mosaic.version = 11 : i64} {
  func.func @_vgcn_kernel(%arg0: i32, %arg1: i32, %arg2: memref<128x128xbf16, #tpu.memory_space<vmem>>, %arg3: memref<1x128x128xbf16, #tpu.memory_space<vmem>>, %arg4: memref<1x128xf32, #tpu.memory_space<vmem>>, %arg5: memref<128x128xf32, #tpu.memory_space<vmem>>) attributes {dimension_semantics = [#tpu.dimension_semantics<parallel>, #tpu.dimension_semantics<arbitrary>], iteration_bounds = array<i64: 1, 1>, scalar_prefetch = 0 : i64, scratch_operands = 0 : i64, tpu.core_type = #tpu.core_type<tc>, window_params = [{transform_indices = @transform_0, window_bounds = array<i64: 128, 128>}, {pipeline_mode = #tpu.pipeline_mode<synchronous>, transform_indices = @transform_1, window_bounds = array<i64: 1, 128, 128>}, {pipeline_mode = #tpu.pipeline_mode<synchronous>, transform_indices = @transform_2, window_bounds = array<i64: 1, 128>}, {transform_indices = @transform_3, window_bounds = array<i64: 128, 128>}]} {
    %c0_i32 = arith.constant 0 : i32
    %0 = arith.cmpi eq, %arg1, %c0_i32 : i32
    %1 = arith.extui %0 : i1 to i32
    %c0_i32_0 = arith.constant 0 : i32
    %2 = arith.cmpi ne, %1, %c0_i32_0 : i32
    scf.if %2 {
      %c0_8 = arith.constant 0 : index
      %c0_9 = arith.constant 0 : index
      %11 = vector.load %arg4[%c0_8, %c0_9] : memref<1x128xf32, #tpu.memory_space<vmem>>, vector<1x128xf32>
      %12 = vector.shape_cast %11 : vector<1x128xf32> to vector<1x128xf32>
      %13 = vector.broadcast %12 : vector<1x128xf32> to vector<128x128xf32>
      %c0_10 = arith.constant 0 : index
      %c0_11 = arith.constant 0 : index
      %14 = vector.load %arg5[%c0_10, %c0_11] : memref<128x128xf32, #tpu.memory_space<vmem>>, vector<128x128xf32>
      tpu.vector_store %arg5[%c0_10, %c0_11], %13 {strides = array<i32>} : memref<128x128xf32, #tpu.memory_space<vmem>>, vector<128x128xf32>,
    } else {
    }
    %c0 = arith.constant 0 : index
    %c0_1 = arith.constant 0 : index
    %3 = vector.load %arg5[%c0, %c0_1] : memref<128x128xf32, #tpu.memory_space<vmem>>, vector<128x128xf32>
    %c0_2 = arith.constant 0 : index
    %c0_3 = arith.constant 0 : index
    %4 = vector.load %arg2[%c0_2, %c0_3] : memref<128x128xbf16, #tpu.memory_space<vmem>>, vector<128x128xbf16>
    %5 = arith.index_cast %arg1 : i32 to index
    %c0_4 = arith.constant 0 : index
    %c0_5 = arith.constant 0 : index
    %6 = vector.load %arg3[%5, %c0_4, %c0_5] : memref<1x128x128xbf16, #tpu.memory_space<vmem>>, vector<1x128x128xbf16>
    %7 = vector.shape_cast %6 : vector<1x128x128xbf16> to vector<128x128xbf16>
    %cst = arith.constant dense<0.000000e+00> : vector<128x128xf32>
    %8 = tpu.matmul %4, %7, %cst {dimension_numbers = #tpu.dot_dimension_numbers<[1], [0], [0], [1], [0, 0, 1, 1], [], []>} : vector<128x128xbf16>, vector<128x128xbf16>, vector<128x128xf32> -> vector<128x128xf32>
    %9 = arith.addf %3, %8 : vector<128x128xf32>
    %c0_6 = arith.constant 0 : index
    %c0_7 = arith.constant 0 : index
    %10 = vector.load %arg5[%c0_6, %c0_7] : memref<128x128xf32, #tpu.memory_space<vmem>>, vector<128x128xf32>
    tpu.vector_store %arg5[%c0_6, %c0_7], %9 {strides = array<i32>} : memref<128x128xf32, #tpu.memory_space<vmem>>, vector<128x128xf32>,
    return
  }
  func.func @transform_0(%arg0: i32, %arg1: i32) -> (i32, i32) {
    %c0_i32 = arith.constant 0 : i32
    return %arg0, %arg1 : i32, i32
  }
  func.func @transform_1(%arg0: i32, %arg1: i32) -> (i32, i32, i32) {
    %c0_i32 = arith.constant 0 : i32
    %c0_i32_0 = arith.constant 0 : i32
    %c0_i32_1 = arith.constant 0 : i32
    %c0_i32_2 = arith.constant 0 : i32
    return %c0_i32, %c0_i32_0, %c0_i32_1 : i32, i32, i32
  }
  func.func @transform_2(%arg0: i32, %arg1: i32) -> (i32, i32) {
    %c0_i32 = arith.constant 0 : i32
    %c0_i32_0 = arith.constant 0 : i32
    %c0_i32_1 = arith.constant 0 : i32
    return %c0_i32, %c0_i32_0 : i32, i32
  }
  func.func @transform_3(%arg0: i32, %arg1: i32) -> (i32, i32) {
    %c0_i32 = arith.constant 0 : i32
    %c0_i32_0 = arith.constant 0 : i32
    return %arg0, %c0_i32 : i32, i32
  }
}

</mosaic_0001>

<bundles_post_ra>
// kernel: tpu_custom_call.1
= control target key start
LH: loop header
LB: loop body
LE: loop exit
PB: predicated region body
PF: predicated region fallthrough
CT: control target
= control target key end

     0   :  { %8 = vsyncpa [#allocation3], 0  ;;  %s607_s0 = inlined_call_operand.hbm [shape: bf16[128,128], index: 0, kind: input, shape index: {}]   ;;  %s608_s1 = inlined_call_operand.hbm [shape: bf16[1,128,128], index: 1, kind: input, shape index: {}]   ;;  %s609_s2 = inlined_call_operand.vmem [shape: f32[1,128], index: 2, kind: input, shape index: {}]   ;;  %s610_s3 = inlined_call_operand.hbm [shape: f32[128,128], index: 3, kind: output, shape index: {}]  }
   0x1   :  { %9 = vsyncpa [#allocation6], 0 }
   0x2   :  { %10 = vsyncpa [#allocation4], 0  ;;  %s541_s12 = smov [#allocation2]   ;;  %s469_s16 = scalar_lea.hbm %s607_s0, 1024 }
   0x3   :  { %s16_s13 = sshll.u32 %s541_s12, 4  ;;  %p470_p0 = scmp.ne.s32.totalorder %s607_s0, %s469_s16  ;;  %s17_s13 = int_to_ptr.vmem [resolvable:$true] %s16_s13 }
   0x4   :  { %p473_p1 = scmp.lt.u32.totalorder %s469_s16, %s607_s0 }
   0x6   :  { %p475_p2 = pnand %p473_p1, %p470_p0 }
   0x8   :  { %478 = shalt.err (!%p475_p2)
}
   0x9   :  { %s479_s21 = scalar_lea.vmem %s17_s13, 1024  ;;  %p484_p4 = scmp.lt.s32.totalorder %s17_s13, %s17_s13 }
   0xa   :  { %p480_p3 = scmp.ne.s32.totalorder %s17_s13, %s479_s21  ;;  %p485_p5 = scmp.lt.s32.totalorder %s479_s21, %s479_s21 }
   0xc   :  { %p486_p6 = por %p485_p5, %p484_p4 }
   0xe   :  { %p487_p7 = pnand %p486_p6, %p480_p3 }
  0x10   :  { %490 = shalt.err (!%p487_p7)
}
  0x11   :  { %s542_s22 = smov 64   ;;  %s543_s23 = smov 4  }
  0x12   :  { %22 = dma.hbm_to_vmem [thread:$0]  %s607_s0, 1024, %s17_s13, [#allocation3], %s542_s22, %s542_s22, %s543_s23  }
  0x13   :  { %s544_s26 = smov [#allocation5]   ;;  %s491_s30 = scalar_lea.hbm %s608_s1, 1024 }
  0x14   :  { %s28_s27 = sshll.u32 %s544_s26, 4  ;;  %p492_p8 = scmp.ne.s32.totalorder %s608_s1, %s491_s30  ;;  %s29_s27 = int_to_ptr.vmem [resolvable:$true] %s28_s27 }
  0x15   :  { %p495_p9 = scmp.lt.u32.totalorder %s491_s30, %s608_s1 }
  0x17   :  { %p497_p10 = pnand %p495_p9, %p492_p8 }
  0x19   :  { %500 = shalt.err (!%p497_p10)
}
  0x1a   :  { %s501_s8 = scalar_lea.vmem %s29_s27, 1024  ;;  %p506_p12 = scmp.lt.s32.totalorder %s29_s27, %s29_s27 }
  0x1b   :  { %p502_p11 = scmp.ne.s32.totalorder %s29_s27, %s501_s8  ;;  %p507_p13 = scmp.lt.s32.totalorder %s501_s8, %s501_s8 }
  0x1d   :  { %p508_p0 = por %p507_p13, %p506_p12 }
  0x1f   :  { %p509_p1 = pnand %p508_p0, %p502_p11 }
  0x21   :  { %512 = shalt.err (!%p509_p1)
}
  0x22   :  { %34 = dma.hbm_to_vmem [thread:$0]  %s608_s1, 1024, %s29_s27, [#allocation6], %s542_s22, %s542_s22, %s543_s23  }
  0x23   :  { %535 = dma.done.wait [#allocation3], 1024  }
  0x24   :  { %536 = vsyncadd [#allocation3], 4294966272 }
  0x25   :  { %537 = dma.done.wait [#allocation6], 1024  }
  0x26   :  { %538 = vsyncadd [#allocation6], 4294966272  ;;  %v453_v0 = vld [vmem:[#allocation5] sm:$0xff]   ;;  %v454_v1 = vld [vmem:[#allocation5 + $0x8] sm:$0xff]  }
  0x27   :  { %398 = vmatprep.subr.bf16.mxu0 %v453_v0  ;;  %430 = vmatprep.subr.bf16.mxu1 %v453_v0  ;;  %v455_v2 = vld [vmem:[#allocation5 + $0x10] sm:$0xff]   ;;  %v456_v3 = vld [vmem:[#allocation5 + $0x18] sm:$0xff]   ;;  %v461_v4 = vld [vmem:[#allocation2] sm:$0xff]  }
  0x28   :  { %399 = vmatpush3.bf16.msra.mxu0 %v453_v0  ;;  %438 = vmatpush3.bf16.msra.mxu1 %v453_v0  ;;  %v462_v5 = vld [vmem:[#allocation2 + $0x20] sm:$0xff]   ;;  %v458_v7 = vld [vmem:[#allocation5 + $0x28] sm:$0xff]   ;;  %v459_v8 = vld [vmem:[#allocation5 + $0x30] sm:$0xff]  }
  0x29   :  { %400 = vmatprep.subr.bf16.mxu0 %v454_v1  ;;  %431 = vmatprep.subr.bf16.mxu1 %v454_v1  ;;  %v457_v6 = vld [vmem:[#allocation5 + $0x20] sm:$0xff]   ;;  %v460_v9 = vld [vmem:[#allocation5 + $0x38] sm:$0xff]   ;;  %v463_v10 = vld [vmem:[#allocation2 + $0x8] sm:$0xff]  }
  0x2a   :  { %414 = vmatprep.mubr.bf16.mxu0 %v461_v4  ;;  %422 = vmatprep.mubr.bf16.mxu1 %v462_v5  ;;  %v464_v11 = vld [vmem:[#allocation2 + $0x28] sm:$0xff]   ;;  %v465_v12 = vld [vmem:[#allocation2 + $0x10] sm:$0xff]   ;;  %v467_v14 = vld [vmem:[#allocation2 + $0x18] sm:$0xff]  }
  0x2b   :  { %v466_v13 = vld [vmem:[#allocation2 + $0x30] sm:$0xff]   ;;  %v468_v15 = vld [vmem:[#allocation2 + $0x38] sm:$0xff]   ;;  %v365_v16 = vld [vmem:[%s609_s2] ss:$0 sm:$0xff]  ;;  %s545_s2 = smov [#allocation7]  }
  0x2c   :  { %401 = vmatpush3.bf16.msra.mxu0 %v454_v1  ;;  %439 = vmatpush3.bf16.msra.mxu1 %v454_v1  ;;  %s352_s11 = sshll.u32 %s545_s2, 4  ;;  %s353_s11 = int_to_ptr.vmem [resolvable:$true] %s352_s11 }
  0x2d   :  { %402 = vmatprep.subr.bf16.mxu0 %v455_v2  ;;  %432 = vmatprep.subr.bf16.mxu1 %v455_v2  ;;  %s513_s12 = scalar_lea.vmem %s353_s11, 2048  ;;  %p518_p3 = scmp.lt.s32.totalorder %s353_s11, %s353_s11 }
  0x2e   :  { %p514_p2 = scmp.ne.s32.totalorder %s353_s11, %s513_s12  ;;  %p519_p4 = scmp.lt.s32.totalorder %s513_s12, %s513_s12 }
  0x30   :  { %403 = vmatpush3.bf16.msra.mxu0 %v455_v2  ;;  %440 = vmatpush3.bf16.msra.mxu1 %v455_v2  ;;  %p520_p5 = por %p519_p4, %p518_p3 }
  0x31   :  { %404 = vmatprep.subr.bf16.mxu0 %v456_v3  ;;  %433 = vmatprep.subr.bf16.mxu1 %v456_v3 }
  0x32   :  { %p521_p6 = pnand %p520_p5, %p514_p2 }
  0x34   :  { %405 = vmatpush3.bf16.msra.mxu0 %v456_v3  ;;  %441 = vmatpush3.bf16.msra.mxu1 %v456_v3 }
  0x35   :  { %406 = vmatprep.subr.bf16.mxu0 %v457_v6  ;;  %434 = vmatprep.subr.bf16.mxu1 %v457_v6 }
  0x38   :  { %407 = vmatpush3.bf16.msra.mxu0 %v457_v6  ;;  %442 = vmatpush3.bf16.msra.mxu1 %v457_v6 }
  0x39   :  { %408 = vmatprep.subr.bf16.mxu0 %v458_v7  ;;  %435 = vmatprep.subr.bf16.mxu1 %v458_v7 }
  0x3c   :  { %409 = vmatpush3.bf16.msra.mxu0 %v458_v7  ;;  %443 = vmatpush3.bf16.msra.mxu1 %v458_v7 }
  0x3d   :  { %410 = vmatprep.subr.bf16.mxu0 %v459_v8  ;;  %436 = vmatprep.subr.bf16.mxu1 %v459_v8 }
  0x40   :  { %411 = vmatpush3.bf16.msra.mxu0 %v459_v8  ;;  %444 = vmatpush3.bf16.msra.mxu1 %v459_v8 }
  0x41   :  { %412 = vmatprep.subr.bf16.mxu0 %v460_v9  ;;  %437 = vmatprep.subr.bf16.mxu1 %v460_v9 }
  0x44   :  { %413 = vmatpush3.bf16.msra.mxu0 %v460_v9  ;;  %445 = vmatpush3.bf16.msra.mxu1 %v460_v9 }
  0x47   :  { %415 = vmatmul.mubr.bf16.vlgmr.msra.gmra.mrb[0].mxu0 %v463_v10  ;;  %423 = vmatmul.mubr.bf16.vlgmr.msra.gmra.mrb[0].mxu1 %v464_v11 }
  0x48   :  { %418 = vmatprep.mubr.bf16.mxu0 %v465_v12  ;;  %426 = vmatprep.mubr.bf16.mxu1 %v466_v13 }
  0x4f   :  { %419 = vmatmul.mubr.bf16.gmra.mrb[4].mxu0 %v467_v14  ;;  %427 = vmatmul.mubr.bf16.gmra.mrb[4].mxu1 %v468_v15 }
 0x11a   :  { %v416_v17 = vpop.f32.mrb[0].mxu0  ;;  %v424_v18 = vpop.f32.mrb[0].mxu1 }
 0x11b   :  { %v317_v19 = vadd.f32 %v416_v17, %v365_v16  ;;  %v325_v20 = vadd.f32 %v424_v18, %v365_v16  ;;  %v252_v21 = vpop.f32.mrb[1].mxu0  ;;  %v284_v22 = vpop.f32.mrb[1].mxu1 }
 0x11c   :  { %v315_v23 = vadd.f32 %v365_v16, %v252_v21  ;;  %v323_v24 = vadd.f32 %v365_v16, %v284_v22  ;;  %v417_v25 = vpop.f32.mrb[2].mxu0  ;;  %v425_v26 = vpop.f32.mrb[2].mxu1 }
 0x11d   :  { %333 = vst [vmem:[#allocation7 + $0x10] sm:$0xff] %v317_v19  ;;  %341 = vst [vmem:[#allocation7 + $0x50] sm:$0xff] %v325_v20  ;;  %v318_v27 = vadd.f32 %v417_v25, %v365_v16  ;;  %v326_v28 = vadd.f32 %v425_v26, %v365_v16  ;;  %v255_v29 = vpop.f32.mrb[3].mxu0  ;;  %v287_v30 = vpop.f32.mrb[3].mxu1 }
 0x11e   :  { %331 = vst [vmem:[#allocation7] sm:$0xff] %v315_v23  ;;  %339 = vst [vmem:[#allocation7 + $0x40] sm:$0xff] %v323_v24  ;;  %v316_v31 = vadd.f32 %v365_v16, %v255_v29  ;;  %v324_v32 = vadd.f32 %v365_v16, %v287_v30 }
 0x11f   :  { %334 = vst [vmem:[#allocation7 + $0x18] sm:$0xff] %v318_v27  ;;  %342 = vst [vmem:[#allocation7 + $0x58] sm:$0xff] %v326_v28 }
 0x120   :  { %332 = vst [vmem:[#allocation7 + $0x8] sm:$0xff] %v316_v31  ;;  %340 = vst [vmem:[#allocation7 + $0x48] sm:$0xff] %v324_v32 }
 0x122   :  { %v420_v33 = vpop.f32.mrb[4].mxu0  ;;  %v428_v34 = vpop.f32.mrb[4].mxu1 }
 0x123   :  { %v321_v35 = vadd.f32 %v420_v33, %v365_v16  ;;  %v329_v36 = vadd.f32 %v428_v34, %v365_v16  ;;  %v268_v37 = vpop.f32.mrb[5].mxu0  ;;  %v300_v38 = vpop.f32.mrb[5].mxu1 }
 0x124   :  { %v319_v39 = vadd.f32 %v365_v16, %v268_v37  ;;  %v327_v40 = vadd.f32 %v365_v16, %v300_v38  ;;  %v421_v41 = vpop.f32.mrb[6].mxu0  ;;  %v429_v42 = vpop.f32.mrb[6].mxu1 }
 0x125   :  { %337 = vst [vmem:[#allocation7 + $0x30] sm:$0xff] %v321_v35  ;;  %345 = vst [vmem:[#allocation7 + $0x70] sm:$0xff] %v329_v36  ;;  %v322_v43 = vadd.f32 %v421_v41, %v365_v16  ;;  %v330_v44 = vadd.f32 %v429_v42, %v365_v16  ;;  %v271_v45 = vpop.f32.mrb[7].mxu0  ;;  %v303_v46 = vpop.f32.mrb[7].mxu1 }
 0x126   :  { %335 = vst [vmem:[#allocation7 + $0x20] sm:$0xff] %v319_v39  ;;  %343 = vst [vmem:[#allocation7 + $0x60] sm:$0xff] %v327_v40  ;;  %v320_v47 = vadd.f32 %v365_v16, %v271_v45  ;;  %v328_v48 = vadd.f32 %v365_v16, %v303_v46 }
 0x127   :  { %338 = vst [vmem:[#allocation7 + $0x38] sm:$0xff] %v322_v43  ;;  %346 = vst [vmem:[#allocation7 + $0x78] sm:$0xff] %v330_v44 }
 0x128   :  { %336 = vst [vmem:[#allocation7 + $0x28] sm:$0xff] %v320_v47  ;;  %344 = vst [vmem:[#allocation7 + $0x68] sm:$0xff] %v328_v48 }
 0x129   :  { %524 = shalt.err (!%p521_p6)
}
 0x12a   :  { %s525_s15 = scalar_lea.hbm %s610_s3, 2048 }
 0x12b   :  { %p526_p7 = scmp.ne.s32.totalorder %s610_s3, %s525_s15  ;;  %p529_p8 = scmp.lt.u32.totalorder %s525_s15, %s610_s3 }
 0x12d   :  { %p531_p9 = pnand %p529_p8, %p526_p7 }
 0x12f   :  { %534 = shalt.err (!%p531_p9)
}
 0x130   :  { %s546_s20 = smov 128   ;;  %s547_s21 = smov 8  }
 0x131   :  { %358 = dma.vmem_to_hbm [thread:$0]  %s353_s11, 2048, %s610_s3, [#allocation4], %s546_s20, %s546_s20, %s547_s21  }
 0x132   :  { %539 = dma.done.wait [#allocation4], 2048  }
 0x133   :  { %540 = vsyncadd [#allocation4], 4294965248 }
 0x134   :  { %362 = vsyncpa [#allocation3], 1 }
 0x135   :  { %363 = vsyncpa [#allocation6], 1 }
 0x136   :  { %364 = vsyncpa [#allocation4], 1 }

</bundles_post_ra>
